<compile_context>
chip_gen: v5e
topology: v5e:2x2
jax: 0.10.0
libtpu: 0.0.40
codegen_flags: <defaults>
</compile_context>

<pallas_src>
import math

import jax
import jax.numpy as jnp
from jax import lax
from jax.experimental import pallas as pl
from jax.experimental.pallas import tpu as pltpu


def _round_up(x, m):
    return (x + m - 1) // m * m


def _nbytes(*arrays):
    return int(sum(a.size * a.dtype.itemsize for a in arrays))


# ---------------------------------------------------------------------------
# One-time parameter preparation (hoisted out of the forward pass; under jit
# this constant-folds).
# ---------------------------------------------------------------------------
def fuse_params(params, lane=128):
    """Fuse per-head weights into lane-dense matrices.

    Folds the 1/sqrt(Dq) attention scale into Wq/bq and pads the model dim to
    a multiple of `lane` (zero rows/columns are numerically exact) so kernel
    loads/stores along Dm are full-lane.
    """
    wq, bq, wk, bk, wv, bv, wo, bo = params
    H, Dm, Dq = wq.shape
    F = H * Dq
    scale = 1.0 / math.sqrt(Dq)

    def fuse_in(w, b):
        # wq_f[m, h*Dq + d] = wq[h, m, d]  ->  x @ wq_f == concat_h(x @ wq[h])
        return jnp.transpose(w, (1, 0, 2)).reshape(Dm, F), b.reshape(1, F)

    wq_f, bq_f = fuse_in(wq, bq)
    wq_f, bq_f = wq_f * scale, bq_f * scale          # fold softmax scale
    wk_f, bk_f = fuse_in(wk, bk)
    wv_f, bv_f = fuse_in(wv, bv)
    wo_f = wo.reshape(F, Dm)                          # concat-over-heads order
    bo_f = bo.reshape(1, Dm)

    Dm_p = _round_up(Dm, lane)
    if Dm_p != Dm:
        pad_rows = ((0, Dm_p - Dm), (0, 0))
        pad_cols = ((0, 0), (0, Dm_p - Dm))
        wq_f = jnp.pad(wq_f, pad_rows)
        wk_f = jnp.pad(wk_f, pad_rows)
        wv_f = jnp.pad(wv_f, pad_rows)
        wo_f = jnp.pad(wo_f, pad_cols)
        bo_f = jnp.pad(bo_f, pad_cols)

    return (wq_f, bq_f, wk_f, bk_f, wv_f, bv_f, wo_f, bo_f), (H, Dq)


# ---------------------------------------------------------------------------
# Stage 1: fused K/V projection (computed exactly once, not per query tile).
# ---------------------------------------------------------------------------
def _kv_project_kernel(k_ref, v_ref, wk_ref, bk_ref, wv_ref, bv_ref,
                       kp_ref, vp_ref):
    kp = jnp.dot(k_ref[...], wk_ref[...],
                 preferred_element_type=jnp.float32) + bk_ref[...]
    vp = jnp.dot(v_ref[...], wv_ref[...],
                 preferred_element_type=jnp.float32) + bv_ref[...]
    kp_ref[...] = kp.astype(kp_ref.dtype)
    vp_ref[...] = vp.astype(vp_ref.dtype)


def _project_kv(K, V, wk_f, bk_f, wv_f, bv_f, tk, out_dtype, single_buffer):
    Sk, Dm_p = K.shape
    F = wk_f.shape[1]
    nkv = Sk // tk

    def w_spec(shape):
        kw = {"pipeline_mode": pl.Buffered(1)} if single_buffer else {}
        return pl.BlockSpec(shape, lambda s, _n=len(shape): (0,) * _n, **kw)

    row_in = pl.BlockSpec((tk, Dm_p), lambda s: (s, 0))
    row_out = pl.BlockSpec((tk, F), lambda s: (s, 0))

    flops = 2 * 2 * Sk * Dm_p * F
    bytes_accessed = _nbytes(K, V, wk_f, bk_f, wv_f, bv_f) + \
        2 * Sk * F * jnp.dtype(out_dtype).itemsize

    return pl.pallas_call(
        _kv_project_kernel,
        out_shape=(jax.ShapeDtypeStruct((Sk, F), out_dtype),
                   jax.ShapeDtypeStruct((Sk, F), out_dtype)),
        grid_spec=pltpu.PrefetchScalarGridSpec(
            num_scalar_prefetch=0,
            grid=(nkv,),
            in_specs=[row_in, row_in,
                      w_spec((Dm_p, F)), w_spec((1, F)),
                      w_spec((Dm_p, F)), w_spec((1, F))],
            out_specs=[row_out, row_out],
        ),
        compiler_params=pltpu.CompilerParams(
            dimension_semantics=("parallel",),
            vmem_limit_bytes=64 * 1024 * 1024),
        cost_estimate=pl.CostEstimate(flops=flops, transcendentals=0,
                                      bytes_accessed=bytes_accessed),
    )(K, V, wk_f, bk_f, wv_f, bv_f)


# ---------------------------------------------------------------------------
# Stage 2: flash-style multi-head cross attention + output projection.
# ---------------------------------------------------------------------------
def _make_attention_kernel(num_heads, head_dim):
    def kernel(q_ref, wq_ref, bq_ref, kp_ref, vp_ref, wo_ref, bo_ref,
               out_ref, qp_sc, m_sc, l_sc, acc_sc):
        j = pl.program_id(1)

        @pl.when(j == 0)
        def _init():
            # Q projection once per query tile (scale already folded into Wq).
            qp = jnp.dot(q_ref[...], wq_ref[...],
                         preferred_element_type=jnp.float32) + bq_ref[...]
            qp_sc[...] = qp.astype(qp_sc.dtype)
            m_sc[...] = jnp.full_like(m_sc, -jnp.inf)
            l_sc[...] = jnp.zeros_like(l_sc)
            acc_sc[...] = jnp.zeros_like(acc_sc)

        kp = kp_ref[...]                              # [tk, H*Dq], compute dtype
        vp = vp_ref[...]
        # num_heads is a trace-time constant; this loop unrolls, slices static.
        for h in range(num_heads):
            sl = slice(h * head_dim, (h + 1) * head_dim)
            q_h = qp_sc[:, sl]                        # [tq, Dq]
            k_h = kp[:, sl]                           # [tk, Dq]
            v_h = vp[:, sl]
            # Contract the head dim of both operands (no explicit kp.T).
            s = lax.dot_general(q_h, k_h, (((1,), (1,)), ((), ())),
                                preferred_element_type=jnp.float32)
            m_prev = m_sc[:, h:h + 1]
            l_prev = l_sc[:, h:h + 1]
            m_new = jnp.maximum(m_prev, jnp.max(s, axis=-1, keepdims=True))
            alpha = jnp.exp(m_prev - m_new)
            p = jnp.exp(s - m_new)                    # f32 VPU math
            l_sc[:, h:h + 1] = alpha * l_prev + jnp.sum(p, -1, keepdims=True)
            acc_sc[:, sl] = alpha * acc_sc[:, sl] + jnp.dot(
                p.astype(v_h.dtype), v_h, preferred_element_type=jnp.float32)
            m_sc[:, h:h + 1] = m_new

        @pl.when(j == pl.num_programs(1) - 1)
        def _finalize():
            for h in range(num_heads):
                sl = slice(h * head_dim, (h + 1) * head_dim)
                inv = pl.reciprocal(l_sc[:, h:h + 1], approx=True)  # EUP slot
                acc_sc[:, sl] = acc_sc[:, sl] * inv
            out = jnp.dot(acc_sc[...].astype(wo_ref.dtype), wo_ref[...],
                          preferred_element_type=jnp.float32) + bo_ref[...]
            out_ref[...] = out.astype(out_ref.dtype)

    return kernel


def _attention_call(Q, wq_f, bq_f, kp, vp, wo_f, bo_f, num_heads, head_dim,
                    tq, tk, out_dtype, single_buffer):
    Sq_p, Dm_p = Q.shape
    Sk, F = kp.shape
    nq = Sq_p // tq
    nkv = Sk // tk
    cdtype = Q.dtype

    def w_spec(shape):
        kw = {"pipeline_mode": pl.Buffered(1)} if single_buffer else {}
        return pl.BlockSpec(shape, lambda i, j, _n=len(shape): (0,) * _n, **kw)

    flops = (2 * Sq_p * Dm_p * F                       # Q projection
             + 2 * 2 * num_heads * Sq_p * Sk * head_dim  # QK^T + PV
             + 2 * Sq_p * F * Dm_p)                    # output projection
    bytes_accessed = _nbytes(Q, kp, vp, wq_f, bq_f, wo_f, bo_f) + \
        Sq_p * Dm_p * jnp.dtype(out_dtype).itemsize

    return pl.pallas_call(
        _make_attention_kernel(num_heads, head_dim),
        out_shape=jax.ShapeDtypeStruct((Sq_p, Dm_p), out_dtype),
        grid_spec=pltpu.PrefetchScalarGridSpec(
            num_scalar_prefetch=0,
            grid=(nq, nkv),
            in_specs=[
                pl.BlockSpec((tq, Dm_p), lambda i, j: (i, 0)),   # Q tile
                w_spec((Dm_p, F)),                               # Wq (scaled)
                w_spec((1, F)),                                  # bq (scaled)
                pl.BlockSpec((tk, F), lambda i, j: (j, 0)),      # Kp tile
                pl.BlockSpec((tk, F), lambda i, j: (j, 0)),      # Vp tile
                w_spec((F, Dm_p)),                               # Wo
                w_spec((1, Dm_p)),                               # bo
            ],
            out_specs=pl.BlockSpec((tq, Dm_p), lambda i, j: (i, 0)),
            scratch_shapes=[
                pltpu.VMEM((tq, F), cdtype),        # projected queries
                pltpu.VMEM((tq, num_heads), jnp.float32),   # running max
                pltpu.VMEM((tq, num_heads), jnp.float32),   # running sum
                pltpu.VMEM((tq, F), jnp.float32),           # output accum
            ],
        ),
        compiler_params=pltpu.CompilerParams(
            dimension_semantics=("parallel", "arbitrary"),
            vmem_limit_bytes=64 * 1024 * 1024),
        cost_estimate=pl.CostEstimate(
            flops=flops,
            transcendentals=num_heads * Sq_p * Sk,
            bytes_accessed=bytes_accessed),
    )(Q, wq_f, bq_f, kp, vp, wo_f, bo_f)


def cross_attention(Q, K, V, fused_params, head_shape):
    wq_f, bq_f, wk_f, bk_f, wv_f, bv_f, wo_f, bo_f = fused_params
    num_heads, head_dim = head_shape
    Sq, Dm = Q.shape
    Sk = K.shape[0]
    Dm_p = wq_f.shape[0]          # weights were Dm-padded in fuse_params
    cdtype = Q.dtype

    # Cast weight matrices to the activation dtype so the MXU runs its native
    # bf16 path for bf16 activations (f32 accumulation via
    # preferred_element_type; biases stay f32).
    wq_f = wq_f.astype(cdtype)
    wk_f = wk_f.astype(cdtype)
    wv_f = wv_f.astype(cdtype)
    wo_f = wo_f.astype(cdtype)

    # Pad activation model dim to the lane-dense width used by the weights.
    if Dm_p != Dm:
        pad = ((0, 0), (0, Dm_p - Dm))
        Q = jnp.pad(Q, pad)
        K = jnp.pad(K, pad)
        V = jnp.pad(V, pad)

    # Query tiling: >=2 tiles once Sq >= 256 (v7x megacore), 128-512 tiles.
    if Sq >= 1024:
        tq = 512
    elif Sq >= 512:
        tq = 256
    elif Sq >= 256:
        tq = 128
    else:
        tq = _round_up(Sq, 8)
    nq = pl.cdiv(Sq, tq)
    Sq_p = nq * tq
    if Sq_p != Sq:
        Q = jnp.pad(Q, ((0, Sq_p - Sq), (0, 0)))   # padded rows sliced off below

    # KV tiling: largest standard tile that divides Sk, else one full block.
    tk = Sk
    for cand in (512, 256, 128):
        if Sk % cand == 0:
            tk = cand
            break

    # Stage 1: project K and V exactly once.
    try:
        kp, vp = _project_kv(K, V, wk_f, bk_f, wv_f, bv_f, tk, cdtype, True)
    except Exception:   # pl.Buffered(1) unsupported -> default double buffering
        kp, vp = _project_kv(K, V, wk_f, bk_f, wv_f, bv_f, tk, cdtype, False)

    # Stage 2: flash-style attention + output projection.
    try:
        out = _attention_call(Q, wq_f, bq_f, kp, vp, wo_f, bo_f, num_heads,
                              head_dim, tq, tk, cdtype, True)
    except Exception:
        out = _attention_call(Q, wq_f, bq_f, kp, vp, wo_f, bo_f, num_heads,
                              head_dim, tq, tk, cdtype, False)

    return out[:Sq, :Dm]


def reference(Q, K, V, params):
    """Plain-JAX reference mirroring the PyTorch module exactly."""
    wq, bq, wk, bk, wv, bv, wo, bo = params
    heads = []
    for h in range(wq.shape[0]):
        qp = Q @ wq[h] + bq[h]
        kp = K @ wk[h] + bk[h]
        vp = V @ wv[h] + bv[h]
        s = (qp @ kp.T) / (kp.shape[-1] ** 0.5)
        p = jax.nn.softmax(s, axis=-1)
        heads.append(p @ vp)
    concat = jnp.concatenate(heads, axis=-1)          # [Sq, H*Dq]
    wo_flat = wo.reshape(-1, wo.shape[-1])            # [H*Dq, Dm]
    return concat @ wo_flat + bo


if __name__ == "__main__":
    # Small shapes consistent with the module:
    #   number_of_heads=2, model_dimensions=32, seq_dimensions (head dim)=16,
    #   query length Sq=8, key/value length Sk=8.
    H, Dm, Dq = 2, 32, 16
    Sq, Sk = 8, 8

    key = jax.random.PRNGKey(0)
    keys = jax.random.split(key, 11)

    Q = jax.random.normal(keys[0], (Sq, Dm), dtype=jnp.float32)
    K = jax.random.normal(keys[1], (Sk, Dm), dtype=jnp.float32)
    V = jax.random.normal(keys[2], (Sk, Dm), dtype=jnp.float32)

    # Deterministic synthetic parameters (stored pre-transposed: y = x @ W + b).
    wq = 0.1 * jax.random.normal(keys[3], (H, Dm, Dq), dtype=jnp.float32)
    bq = 0.1 * jax.random.normal(keys[4], (H, Dq), dtype=jnp.float32)
    wk = 0.1 * jax.random.normal(keys[5], (H, Dm, Dq), dtype=jnp.float32)
    bk = 0.1 * jax.random.normal(keys[6], (H, Dq), dtype=jnp.float32)
    wv = 0.1 * jax.random.normal(keys[7], (H, Dm, Dq), dtype=jnp.float32)
    bv = 0.1 * jax.random.normal(keys[8], (H, Dq), dtype=jnp.float32)
    wo = 0.1 * jax.random.normal(keys[9], (H, Dq, Dm), dtype=jnp.float32)
    bo = 0.1 * jax.random.normal(keys[10], (Dm,), dtype=jnp.float32)

    params = (wq, bq, wk, bk, wv, bv, wo, bo)

    # One-time parameter prep (head fusion, scale folding, Dm lane padding).
    fused_params, head_shape = fuse_params(params)

    out = cross_attention(Q, K, V, fused_params, head_shape)
    out = jax.block_until_ready(out)

    ref = reference(Q, K, V, params)
    assert out.shape == (Sq, Dm), out.shape
    # Tolerance accounts for pl.reciprocal(approx=True) in the softmax
    # denominator (~2^-12 relative error).
    assert jnp.allclose(out, ref, atol=1e-3, rtol=1e-3), (
        float(jnp.max(jnp.abs(out - ref))))

    print("KERNEL_OK")
</pallas_src>

<mosaic_0001>
module attributes {stable_mosaic.version = 11 : i64} {
  func.func @_kv_project_kernel(%arg0: i32, %arg1: memref<8x128xf32, #tpu.memory_space<vmem>>, %arg2: memref<8x128xf32, #tpu.memory_space<vmem>>, %arg3: memref<128x32xf32, #tpu.memory_space<vmem>>, %arg4: memref<1x32xf32, #tpu.memory_space<vmem>>, %arg5: memref<128x32xf32, #tpu.memory_space<vmem>>, %arg6: memref<1x32xf32, #tpu.memory_space<vmem>>, %arg7: memref<8x32xf32, #tpu.memory_space<vmem>>, %arg8: memref<8x32xf32, #tpu.memory_space<vmem>>) attributes {dimension_semantics = [#tpu.dimension_semantics<parallel>], iteration_bounds = array<i64: 1>, scalar_prefetch = 0 : i64, scratch_operands = 0 : i64, tpu.core_type = #tpu.core_type<tc>, window_params = [{transform_indices = @transform_0, window_bounds = array<i64: 8, 128>}, {transform_indices = @transform_1, window_bounds = array<i64: 8, 128>}, {pipeline_mode = #tpu.pipeline_mode<synchronous>, transform_indices = @transform_2, window_bounds = array<i64: 128, 32>}, {pipeline_mode = #tpu.pipeline_mode<synchronous>, transform_indices = @transform_3, window_bounds = array<i64: 1, 32>}, {pipeline_mode = #tpu.pipeline_mode<synchronous>, transform_indices = @transform_4, window_bounds = array<i64: 128, 32>}, {pipeline_mode = #tpu.pipeline_mode<synchronous>, transform_indices = @transform_5, window_bounds = array<i64: 1, 32>}, {transform_indices = @transform_6, window_bounds = array<i64: 8, 32>}, {transform_indices = @transform_7, window_bounds = array<i64: 8, 32>}]} {
    %c0 = arith.constant 0 : index
    %c0_0 = arith.constant 0 : index
    %0 = vector.load %arg1[%c0, %c0_0] : memref<8x128xf32, #tpu.memory_space<vmem>>, vector<8x128xf32>
    %c0_1 = arith.constant 0 : index
    %c0_2 = arith.constant 0 : index
    %1 = vector.load %arg3[%c0_1, %c0_2] : memref<128x32xf32, #tpu.memory_space<vmem>>, vector<128x32xf32>
    %cst = arith.constant dense<0.000000e+00> : vector<8x32xf32>
    %2 = tpu.matmul %0, %1, %cst {dimension_numbers = #tpu.dot_dimension_numbers<[1], [0], [0], [1], [0, 0, 1, 1], [], []>} : vector<8x128xf32>, vector<128x32xf32>, vector<8x32xf32> -> vector<8x32xf32>
    %c0_3 = arith.constant 0 : index
    %c0_4 = arith.constant 0 : index
    %3 = vector.load %arg4[%c0_3, %c0_4] : memref<1x32xf32, #tpu.memory_space<vmem>>, vector<1x32xf32>
    %4 = vector.broadcast %3 : vector<1x32xf32> to vector<8x32xf32>
    %5 = arith.addf %2, %4 : vector<8x32xf32>
    %c0_5 = arith.constant 0 : index
    %c0_6 = arith.constant 0 : index
    %6 = vector.load %arg2[%c0_5, %c0_6] : memref<8x128xf32, #tpu.memory_space<vmem>>, vector<8x128xf32>
    %c0_7 = arith.constant 0 : index
    %c0_8 = arith.constant 0 : index
    %7 = vector.load %arg5[%c0_7, %c0_8] : memref<128x32xf32, #tpu.memory_space<vmem>>, vector<128x32xf32>
    %cst_9 = arith.constant dense<0.000000e+00> : vector<8x32xf32>
    %8 = tpu.matmul %6, %7, %cst_9 {dimension_numbers = #tpu.dot_dimension_numbers<[1], [0], [0], [1], [0, 0, 1, 1], [], []>} : vector<8x128xf32>, vector<128x32xf32>, vector<8x32xf32> -> vector<8x32xf32>
    %c0_10 = arith.constant 0 : index
    %c0_11 = arith.constant 0 : index
    %9 = vector.load %arg6[%c0_10, %c0_11] : memref<1x32xf32, #tpu.memory_space<vmem>>, vector<1x32xf32>
    %10 = vector.broadcast %9 : vector<1x32xf32> to vector<8x32xf32>
    %11 = arith.addf %8, %10 : vector<8x32xf32>
    %c0_12 = arith.constant 0 : index
    %c0_13 = arith.constant 0 : index
    %12 = vector.load %arg7[%c0_12, %c0_13] : memref<8x32xf32, #tpu.memory_space<vmem>>, vector<8x32xf32>
    tpu.vector_store %arg7[%c0_12, %c0_13], %5 {strides = array<i32>} : memref<8x32xf32, #tpu.memory_space<vmem>>, vector<8x32xf32>,
    %c0_14 = arith.constant 0 : index
    %c0_15 = arith.constant 0 : index
    %13 = vector.load %arg8[%c0_14, %c0_15] : memref<8x32xf32, #tpu.memory_space<vmem>>, vector<8x32xf32>
    tpu.vector_store %arg8[%c0_14, %c0_15], %11 {strides = array<i32>} : memref<8x32xf32, #tpu.memory_space<vmem>>, vector<8x32xf32>,
    return
  }
  func.func @transform_0(%arg0: i32) -> (i32, i32) {
    %c0_i32 = arith.constant 0 : i32
    %c0_i32_0 = arith.constant 0 : i32
    return %arg0, %c0_i32 : i32, i32
  }
  func.func @transform_1(%arg0: i32) -> (i32, i32) {
    %c0_i32 = arith.constant 0 : i32
    %c0_i32_0 = arith.constant 0 : i32
    return %arg0, %c0_i32 : i32, i32
  }
  func.func @transform_2(%arg0: i32) -> (i32, i32) {
    %c0_i32 = arith.constant 0 : i32
    %c0_i32_0 = arith.constant 0 : i32
    %c0_i32_1 = arith.constant 0 : i32
    return %c0_i32, %c0_i32_0 : i32, i32
  }
  func.func @transform_3(%arg0: i32) -> (i32, i32) {
    %c0_i32 = arith.constant 0 : i32
    %c0_i32_0 = arith.constant 0 : i32
    %c0_i32_1 = arith.constant 0 : i32
    return %c0_i32, %c0_i32_0 : i32, i32
  }
  func.func @transform_4(%arg0: i32) -> (i32, i32) {
    %c0_i32 = arith.constant 0 : i32
    %c0_i32_0 = arith.constant 0 : i32
    %c0_i32_1 = arith.constant 0 : i32
    return %c0_i32, %c0_i32_0 : i32, i32
  }
  func.func @transform_5(%arg0: i32) -> (i32, i32) {
    %c0_i32 = arith.constant 0 : i32
    %c0_i32_0 = arith.constant 0 : i32
    %c0_i32_1 = arith.constant 0 : i32
    return %c0_i32, %c0_i32_0 : i32, i32
  }
  func.func @transform_6(%arg0: i32) -> (i32, i32) {
    %c0_i32 = arith.constant 0 : i32
    %c0_i32_0 = arith.constant 0 : i32
    return %arg0, %c0_i32 : i32, i32
  }
  func.func @transform_7(%arg0: i32) -> (i32, i32) {
    %c0_i32 = arith.constant 0 : i32
    %c0_i32_0 = arith.constant 0 : i32
    return %arg0, %c0_i32 : i32, i32
  }
}

module attributes {stable_mosaic.version = 11 : i64} {
  func.func @_kv_project_kernel(%arg0: i32, %arg1: memref<8x128xf32, #tpu.memory_space<vmem>>, %arg2: memref<8x128xf32, #tpu.memory_space<vmem>>, %arg3: memref<128x32xf32, #tpu.memory_space<vmem>>, %arg4: memref<1x32xf32, #tpu.memory_space<vmem>>, %arg5: memref<128x32xf32, #tpu.memory_space<vmem>>, %arg6: memref<1x32xf32, #tpu.memory_space<vmem>>, %arg7: memref<8x32xf32, #tpu.memory_space<vmem>>, %arg8: memref<8x32xf32, #tpu.memory_space<vmem>>) attributes {dimension_semantics = [#tpu.dimension_semantics<parallel>], iteration_bounds = array<i64: 1>, scalar_prefetch = 0 : i64, scratch_operands = 0 : i64, tpu.core_type = #tpu.core_type<tc>, window_params = [{transform_indices = @transform_0, window_bounds = array<i64: 8, 128>}, {transform_indices = @transform_1, window_bounds = array<i64: 8, 128>}, {pipeline_mode = #tpu.pipeline_mode<synchronous>, transform_indices = @transform_2, window_bounds = array<i64: 128, 32>}, {pipeline_mode = #tpu.pipeline_mode<synchronous>, transform_indices = @transform_3, window_bounds = array<i64: 1, 32>}, {pipeline_mode = #tpu.pipeline_mode<synchronous>, transform_indices = @transform_4, window_bounds = array<i64: 128, 32>}, {pipeline_mode = #tpu.pipeline_mode<synchronous>, transform_indices = @transform_5, window_bounds = array<i64: 1, 32>}, {transform_indices = @transform_6, window_bounds = array<i64: 8, 32>}, {transform_indices = @transform_7, window_bounds = array<i64: 8, 32>}]} {
    %c0 = arith.constant 0 : index
    %c0_0 = arith.constant 0 : index
    %0 = vector.load %arg1[%c0, %c0_0] : memref<8x128xf32, #tpu.memory_space<vmem>>, vector<8x128xf32>
    %c0_1 = arith.constant 0 : index
    %c0_2 = arith.constant 0 : index
    %1 = vector.load %arg3[%c0_1, %c0_2] : memref<128x32xf32, #tpu.memory_space<vmem>>, vector<128x32xf32>
    %cst = arith.constant dense<0.000000e+00> : vector<8x32xf32>
    %2 = tpu.matmul %0, %1, %cst {dimension_numbers = #tpu.dot_dimension_numbers<[1], [0], [0], [1], [0, 0, 1, 1], [], []>} : vector<8x128xf32>, vector<128x32xf32>, vector<8x32xf32> -> vector<8x32xf32>
    %c0_3 = arith.constant 0 : index
    %c0_4 = arith.constant 0 : index
    %3 = vector.load %arg4[%c0_3, %c0_4] : memref<1x32xf32, #tpu.memory_space<vmem>>, vector<1x32xf32>
    %4 = vector.broadcast %3 : vector<1x32xf32> to vector<8x32xf32>
    %5 = arith.addf %2, %4 : vector<8x32xf32>
    %c0_5 = arith.constant 0 : index
    %c0_6 = arith.constant 0 : index
    %6 = vector.load %arg2[%c0_5, %c0_6] : memref<8x128xf32, #tpu.memory_space<vmem>>, vector<8x128xf32>
    %c0_7 = arith.constant 0 : index
    %c0_8 = arith.constant 0 : index
    %7 = vector.load %arg5[%c0_7, %c0_8] : memref<128x32xf32, #tpu.memory_space<vmem>>, vector<128x32xf32>
    %cst_9 = arith.constant dense<0.000000e+00> : vector<8x32xf32>
    %8 = tpu.matmul %6, %7, %cst_9 {dimension_numbers = #tpu.dot_dimension_numbers<[1], [0], [0], [1], [0, 0, 1, 1], [], []>} : vector<8x128xf32>, vector<128x32xf32>, vector<8x32xf32> -> vector<8x32xf32>
    %c0_10 = arith.constant 0 : index
    %c0_11 = arith.constant 0 : index
    %9 = vector.load %arg6[%c0_10, %c0_11] : memref<1x32xf32, #tpu.memory_space<vmem>>, vector<1x32xf32>
    %10 = vector.broadcast %9 : vector<1x32xf32> to vector<8x32xf32>
    %11 = arith.addf %8, %10 : vector<8x32xf32>
    %c0_12 = arith.constant 0 : index
    %c0_13 = arith.constant 0 : index
    %12 = vector.load %arg7[%c0_12, %c0_13] : memref<8x32xf32, #tpu.memory_space<vmem>>, vector<8x32xf32>
    tpu.vector_store %arg7[%c0_12, %c0_13], %5 {strides = array<i32>} : memref<8x32xf32, #tpu.memory_space<vmem>>, vector<8x32xf32>,
    %c0_14 = arith.constant 0 : index
    %c0_15 = arith.constant 0 : index
    %13 = vector.load %arg8[%c0_14, %c0_15] : memref<8x32xf32, #tpu.memory_space<vmem>>, vector<8x32xf32>
    tpu.vector_store %arg8[%c0_14, %c0_15], %11 {strides = array<i32>} : memref<8x32xf32, #tpu.memory_space<vmem>>, vector<8x32xf32>,
    return
  }
  func.func @transform_0(%arg0: i32) -> (i32, i32) {
    %c0_i32 = arith.constant 0 : i32
    %c0_i32_0 = arith.constant 0 : i32
    return %arg0, %c0_i32 : i32, i32
  }
  func.func @transform_1(%arg0: i32) -> (i32, i32) {
    %c0_i32 = arith.constant 0 : i32
    %c0_i32_0 = arith.constant 0 : i32
    return %arg0, %c0_i32 : i32, i32
  }
  func.func @transform_2(%arg0: i32) -> (i32, i32) {
    %c0_i32 = arith.constant 0 : i32
    %c0_i32_0 = arith.constant 0 : i32
    %c0_i32_1 = arith.constant 0 : i32
    return %c0_i32, %c0_i32_0 : i32, i32
  }
  func.func @transform_3(%arg0: i32) -> (i32, i32) {
    %c0_i32 = arith.constant 0 : i32
    %c0_i32_0 = arith.constant 0 : i32
    %c0_i32_1 = arith.constant 0 : i32
    return %c0_i32, %c0_i32_0 : i32, i32
  }
  func.func @transform_4(%arg0: i32) -> (i32, i32) {
    %c0_i32 = arith.constant 0 : i32
    %c0_i32_0 = arith.constant 0 : i32
    %c0_i32_1 = arith.constant 0 : i32
    return %c0_i32, %c0_i32_0 : i32, i32
  }
  func.func @transform_5(%arg0: i32) -> (i32, i32) {
    %c0_i32 = arith.constant 0 : i32
    %c0_i32_0 = arith.constant 0 : i32
    %c0_i32_1 = arith.constant 0 : i32
    return %c0_i32, %c0_i32_0 : i32, i32
  }
  func.func @transform_6(%arg0: i32) -> (i32, i32) {
    %c0_i32 = arith.constant 0 : i32
    %c0_i32_0 = arith.constant 0 : i32
    return %arg0, %c0_i32 : i32, i32
  }
  func.func @transform_7(%arg0: i32) -> (i32, i32) {
    %c0_i32 = arith.constant 0 : i32
    %c0_i32_0 = arith.constant 0 : i32
    return %arg0, %c0_i32 : i32, i32
  }
}

</mosaic_0001>

<bundles_post_ra>
// kernel: tpu_custom_call.1
= control target key start
LH: loop header
LB: loop body
LE: loop exit
PB: predicated region body
PF: predicated region fallthrough
CT: control target
= control target key end

     0   :  { %13 = vsyncpa [#allocation3], 0  ;;  %s356_s0 = inlined_call_operand.vmem [shape: f32[8,128], index: 0, kind: input, shape index: {}]   ;;  %s357_s1 = inlined_call_operand.vmem [shape: f32[8,128], index: 1, kind: input, shape index: {}]   ;;  %s358_s2 = inlined_call_operand.vmem [shape: f32[128,32], index: 2, kind: input, shape index: {}]   ;;  %s359_s3 = inlined_call_operand.vmem [shape: f32[1,32], index: 3, kind: input, shape index: {}]   ;;  %s360_s4 = inlined_call_operand.vmem [shape: f32[128,32], index: 4, kind: input, shape index: {}]   ;;  %s361_s5 = inlined_call_operand.vmem [shape: f32[1,32], index: 5, kind: input, shape index: {}]   ;;  %s362_s6 = inlined_call_operand.hbm [shape: f32[8,32], index: 6, kind: output, shape index: {0}]   ;;  %s363_s7 = inlined_call_operand.hbm [shape: f32[8,32], index: 7, kind: output, shape index: {1}]  }
   0x1   :  { %v43_v0 = vld [vmem:[%s358_s2 + $0x78] sm:$0xff]  ;;  %v42_v2 = vld [vmem:[%s358_s2 + $0x70] sm:$0xff]  ;;  %v41_v4 = vld [vmem:[%s358_s2 + $0x68] sm:$0xff] }
   0x2   :  { %v84_v1 = vld [vmem:[%s360_s4 + $0x78] sm:$0xff]  ;;  %48 = vmatpush.msra.mxu0 %v43_v0  ;;  %v83_v3 = vld [vmem:[%s360_s4 + $0x70] sm:$0xff]  ;;  %v82_v5 = vld [vmem:[%s360_s4 + $0x68] sm:$0xff] }
   0x3   :  { %89 = vmatpush.msra.mxu1 %v84_v1  ;;  %v40_v6 = vld [vmem:[%s358_s2 + $0x60] sm:$0xff]  ;;  %v39_v8 = vld [vmem:[%s358_s2 + $0x58] sm:$0xff]  ;;  %v38_v10 = vld [vmem:[%s358_s2 + $0x50] sm:$0xff] }
   0x4   :  { %49 = vmatpush.msra.mxu0 %v42_v2  ;;  %v81_v7 = vld [vmem:[%s360_s4 + $0x60] sm:$0xff]  ;;  %v80_v9 = vld [vmem:[%s360_s4 + $0x58] sm:$0xff]  ;;  %v79_v11 = vld [vmem:[%s360_s4 + $0x50] sm:$0xff] }
   0x5   :  { %90 = vmatpush.msra.mxu1 %v83_v3  ;;  %v37_v12 = vld [vmem:[%s358_s2 + $0x48] sm:$0xff]  ;;  %v36_v14 = vld [vmem:[%s358_s2 + $0x40] sm:$0xff] }
   0x6   :  { %50 = vmatpush.msra.mxu0 %v41_v4  ;;  %v78_v13 = vld [vmem:[%s360_s4 + $0x48] sm:$0xff]  ;;  %v77_v15 = vld [vmem:[%s360_s4 + $0x40] sm:$0xff] }
   0x7   :  { %91 = vmatpush.msra.mxu1 %v82_v5 }
   0x8   :  { %51 = vmatpush.msra.mxu0 %v40_v6 }
   0x9   :  { %92 = vmatpush.msra.mxu1 %v81_v7 }
   0xa   :  { %52 = vmatpush.msra.mxu0 %v39_v8 }
   0xb   :  { %93 = vmatpush.msra.mxu1 %v80_v9 }
   0xc   :  { %53 = vmatpush.msra.mxu0 %v38_v10 }
   0xd   :  { %94 = vmatpush.msra.mxu1 %v79_v11 }
   0xe   :  { %14 = vsyncpa [#allocation5], 0  ;;  %54 = vmatpush.msra.mxu0 %v37_v12  ;;  %v35_v16 = vld [vmem:[%s358_s2 + $0x38] sm:$0xff]  ;;  %v34_v18 = vld [vmem:[%s358_s2 + $0x30] sm:$0xff]  ;;  %s200_s25 = smov [#allocation4]   ;;  %s130_s28 = sshll.u32 %s363_s7, 4  ;;  %s131_s28 = int_to_ptr.hbm [resolvable:$true] %s130_s28 }
   0xf   :  { %95 = vmatpush.msra.mxu1 %v78_v13  ;;  %v76_v17 = vld [vmem:[%s360_s4 + $0x38] sm:$0xff]  ;;  %v75_v19 = vld [vmem:[%s360_s4 + $0x30] sm:$0xff]  ;;  %v33_v20 = vld [vmem:[%s358_s2 + $0x28] sm:$0xff]  ;;  %s128_s26 = sshll.u32 %s200_s25, 4  ;;  %s201_s29 = smov [#allocation2]   ;;  %vm109_vm0 = vcmask 261120   ;;  %s129_s26 = int_to_ptr.vmem [resolvable:$true] %s128_s26 }
  0x10   :  { %55 = vmatpush.msra.mxu0 %v36_v14  ;;  %v74_v21 = vld [vmem:[%s360_s4 + $0x28] sm:$0xff]  ;;  %v32_v22 = vld [vmem:[%s358_s2 + $0x20] sm:$0xff]  ;;  %v31_v24 = vld [vmem:[%s358_s2 + $0x18] sm:$0xff]  ;;  %s119_s9 = sshll.u32 %s362_s6, 4  ;;  %s120_s9 = int_to_ptr.hbm [resolvable:$true] %s119_s9 }
  0x11   :  { %96 = vmatpush.msra.mxu1 %v77_v15  ;;  %v73_v23 = vld [vmem:[%s360_s4 + $0x20] sm:$0xff]  ;;  %v72_v25 = vld [vmem:[%s360_s4 + $0x18] sm:$0xff]  ;;  %v30_v26 = vld [vmem:[%s358_s2 + $0x10] sm:$0xff] }
  0x12   :  { %56 = vmatpush.msra.mxu0 %v35_v16  ;;  %v71_v27 = vld [vmem:[%s360_s4 + $0x10] sm:$0xff]  ;;  %v29_v28 = vld [vmem:[%s358_s2 + $0x8] sm:$0xff]  ;;  %v28_v30 = vld [vmem:[%s358_s2] sm:$0xff] }
  0x13   :  { %97 = vmatpush.msra.mxu1 %v76_v17  ;;  %v70_v29 = vld [vmem:[%s360_s4 + $0x8] sm:$0xff]  ;;  %v69_v31 = vld [vmem:[%s360_s4] sm:$0xff] }
  0x14   :  { %57 = vmatpush.msra.mxu0 %v34_v18  ;;  %v27_v32 = vld [vmem:[%s356_s0] sm:$0xff] }
  0x15   :  { %98 = vmatpush.msra.mxu1 %v75_v19  ;;  %v68_v33 = vld [vmem:[%s357_s1] sm:$0xff]  ;;  %s117_s1 = sshll.u32 %s201_s29, 4  ;;  %s118_s1 = int_to_ptr.vmem [resolvable:$true] %s117_s1 }
  0x16   :  { %58 = vmatpush.msra.mxu0 %v33_v20  ;;  %v146_v34 = vld [vmem:[%s359_s3] ss:$0 sm:$0xff] }
  0x17   :  { %99 = vmatpush.msra.mxu1 %v74_v21  ;;  %v147_v35 = vld [vmem:[%s361_s5] ss:$0 sm:$0xff] }
  0x18   :  { %59 = vmatpush.msra.mxu0 %v32_v22 }
  0x19   :  { %100 = vmatpush.msra.mxu1 %v73_v23 }
  0x1a   :  { %60 = vmatpush.msra.mxu0 %v31_v24 }
  0x1b   :  { %101 = vmatpush.msra.mxu1 %v72_v25 }
  0x1c   :  { %61 = vmatpush.msra.mxu0 %v30_v26 }
  0x1d   :  { %102 = vmatpush.msra.mxu1 %v71_v27 }
  0x1e   :  { %62 = vmatpush.msra.mxu0 %v29_v28 }
  0x1f   :  { %103 = vmatpush.msra.mxu1 %v70_v29 }
  0x20   :  { %63 = vmatpush.msra.mxu0 %v28_v30 }
  0x21   :  { %104 = vmatpush.msra.mxu1 %v69_v31  ;;  %64 = vmatmul.f32.vlgmr.msra.gmra.mxu0 %v27_v32 }
  0x22   :  { %105 = vmatmul.f32.vlgmr.msra.gmra.mxu1 %v68_v33 }
  0x9e   :  { %v65_v36 = vpop.f32.mrf.mxu0 }
  0x9f   :  { %v106_v37 = vpop.f32.mrf.mxu1  ;;  %v66_v38 = vadd.f32 %v146_v34, %v65_v36 }
  0xa0   :  { %v107_v39 = vadd.f32 %v147_v35, %v106_v37 }
  0xa1   :  { %110 = vst.msk [vmem:[#allocation2] sm:$0xff] %vm109_vm0, %v66_v38 }
  0xa2   :  { %111 = vst.msk [vmem:[#allocation4] sm:$0xff] %vm109_vm0, %v107_v39  ;;  %122 = dma.vmem_to_hbm [thread:$0]  %s118_s1, 128, %s120_s9, [#allocation3]  }
  0xa3   :  { %133 = dma.vmem_to_hbm [thread:$0]  %s129_s26, 128, %s131_s28, [#allocation5]  }
  0xa4   :  { %196 = dma.done.wait [#allocation3], 128  }
  0xa5   :  { %197 = vsyncadd [#allocation3], 4294967168 }
  0xa6   :  { %198 = dma.done.wait [#allocation5], 128  }
  0xa7   :  { %199 = vsyncadd [#allocation5], 4294967168 }
  0xa8   :  { %142 = vsyncpa [#allocation3], 1 }
  0xa9   :  { %143 = vsyncpa [#allocation5], 1 }

// kernel: tpu_custom_call.1
= control target key start
LH: loop header
LB: loop body
LE: loop exit
PB: predicated region body
PF: predicated region fallthrough
CT: control target
= control target key end

     0   :  { %13 = vsyncpa [#allocation3], 0  ;;  %s356_s0 = inlined_call_operand.vmem [shape: f32[8,128], index: 0, kind: input, shape index: {}]   ;;  %s357_s1 = inlined_call_operand.vmem [shape: f32[8,128], index: 1, kind: input, shape index: {}]   ;;  %s358_s2 = inlined_call_operand.vmem [shape: f32[128,32], index: 2, kind: input, shape index: {}]   ;;  %s359_s3 = inlined_call_operand.vmem [shape: f32[1,32], index: 3, kind: input, shape index: {}]   ;;  %s360_s4 = inlined_call_operand.vmem [shape: f32[128,32], index: 4, kind: input, shape index: {}]   ;;  %s361_s5 = inlined_call_operand.vmem [shape: f32[1,32], index: 5, kind: input, shape index: {}]   ;;  %s362_s6 = inlined_call_operand.hbm [shape: f32[8,32], index: 6, kind: output, shape index: {0}]   ;;  %s363_s7 = inlined_call_operand.hbm [shape: f32[8,32], index: 7, kind: output, shape index: {1}]  }
   0x1   :  { %v43_v0 = vld [vmem:[%s358_s2 + $0x78] sm:$0xff]  ;;  %v42_v2 = vld [vmem:[%s358_s2 + $0x70] sm:$0xff]  ;;  %v41_v4 = vld [vmem:[%s358_s2 + $0x68] sm:$0xff] }
   0x2   :  { %v84_v1 = vld [vmem:[%s360_s4 + $0x78] sm:$0xff]  ;;  %48 = vmatpush.msra.mxu0 %v43_v0  ;;  %v83_v3 = vld [vmem:[%s360_s4 + $0x70] sm:$0xff]  ;;  %v82_v5 = vld [vmem:[%s360_s4 + $0x68] sm:$0xff] }
   0x3   :  { %89 = vmatpush.msra.mxu1 %v84_v1  ;;  %v40_v6 = vld [vmem:[%s358_s2 + $0x60] sm:$0xff]  ;;  %v39_v8 = vld [vmem:[%s358_s2 + $0x58] sm:$0xff]  ;;  %v38_v10 = vld [vmem:[%s358_s2 + $0x50] sm:$0xff] }
   0x4   :  { %49 = vmatpush.msra.mxu0 %v42_v2  ;;  %v81_v7 = vld [vmem:[%s360_s4 + $0x60] sm:$0xff]  ;;  %v80_v9 = vld [vmem:[%s360_s4 + $0x58] sm:$0xff]  ;;  %v79_v11 = vld [vmem:[%s360_s4 + $0x50] sm:$0xff] }
   0x5   :  { %90 = vmatpush.msra.mxu1 %v83_v3  ;;  %v37_v12 = vld [vmem:[%s358_s2 + $0x48] sm:$0xff]  ;;  %v36_v14 = vld [vmem:[%s358_s2 + $0x40] sm:$0xff] }
   0x6   :  { %50 = vmatpush.msra.mxu0 %v41_v4  ;;  %v78_v13 = vld [vmem:[%s360_s4 + $0x48] sm:$0xff]  ;;  %v77_v15 = vld [vmem:[%s360_s4 + $0x40] sm:$0xff] }
   0x7   :  { %91 = vmatpush.msra.mxu1 %v82_v5 }
   0x8   :  { %51 = vmatpush.msra.mxu0 %v40_v6 }
   0x9   :  { %92 = vmatpush.msra.mxu1 %v81_v7 }
   0xa   :  { %52 = vmatpush.msra.mxu0 %v39_v8 }
   0xb   :  { %93 = vmatpush.msra.mxu1 %v80_v9 }
   0xc   :  { %53 = vmatpush.msra.mxu0 %v38_v10 }
   0xd   :  { %94 = vmatpush.msra.mxu1 %v79_v11 }
   0xe   :  { %14 = vsyncpa [#allocation5], 0  ;;  %54 = vmatpush.msra.mxu0 %v37_v12  ;;  %v35_v16 = vld [vmem:[%s358_s2 + $0x38] sm:$0xff]  ;;  %v34_v18 = vld [vmem:[%s358_s2 + $0x30] sm:$0xff]  ;;  %s200_s25 = smov [#allocation4]   ;;  %s130_s28 = sshll.u32 %s363_s7, 4  ;;  %s131_s28 = int_to_ptr.hbm [resolvable:$true] %s130_s28 }
   0xf   :  { %95 = vmatpush.msra.mxu1 %v78_v13  ;;  %v76_v17 = vld [vmem:[%s360_s4 + $0x38] sm:$0xff]  ;;  %v75_v19 = vld [vmem:[%s360_s4 + $0x30] sm:$0xff]  ;;  %v33_v20 = vld [vmem:[%s358_s2 + $0x28] sm:$0xff]  ;;  %s128_s26 = sshll.u32 %s200_s25, 4  ;;  %s201_s29 = smov [#allocation2]   ;;  %vm109_vm0 = vcmask 261120   ;;  %s129_s26 = int_to_ptr.vmem [resolvable:$true] %s128_s26 }
  0x10   :  { %55 = vmatpush.msra.mxu0 %v36_v14  ;;  %v74_v21 = vld [vmem:[%s360_s4 + $0x28] sm:$0xff]  ;;  %v32_v22 = vld [vmem:[%s358_s2 + $0x20] sm:$0xff]  ;;  %v31_v24 = vld [vmem:[%s358_s2 + $0x18] sm:$0xff]  ;;  %s119_s9 = sshll.u32 %s362_s6, 4  ;;  %s120_s9 = int_to_ptr.hbm [resolvable:$true] %s119_s9 }
  0x11   :  { %96 = vmatpush.msra.mxu1 %v77_v15  ;;  %v73_v23 = vld [vmem:[%s360_s4 + $0x20] sm:$0xff]  ;;  %v72_v25 = vld [vmem:[%s360_s4 + $0x18] sm:$0xff]  ;;  %v30_v26 = vld [vmem:[%s358_s2 + $0x10] sm:$0xff] }
  0x12   :  { %56 = vmatpush.msra.mxu0 %v35_v16  ;;  %v71_v27 = vld [vmem:[%s360_s4 + $0x10] sm:$0xff]  ;;  %v29_v28 = vld [vmem:[%s358_s2 + $0x8] sm:$0xff]  ;;  %v28_v30 = vld [vmem:[%s358_s2] sm:$0xff] }
  0x13   :  { %97 = vmatpush.msra.mxu1 %v76_v17  ;;  %v70_v29 = vld [vmem:[%s360_s4 + $0x8] sm:$0xff]  ;;  %v69_v31 = vld [vmem:[%s360_s4] sm:$0xff] }
  0x14   :  { %57 = vmatpush.msra.mxu0 %v34_v18  ;;  %v27_v32 = vld [vmem:[%s356_s0] sm:$0xff] }
  0x15   :  { %98 = vmatpush.msra.mxu1 %v75_v19  ;;  %v68_v33 = vld [vmem:[%s357_s1] sm:$0xff]  ;;  %s117_s1 = sshll.u32 %s201_s29, 4  ;;  %s118_s1 = int_to_ptr.vmem [resolvable:$true] %s117_s1 }
  0x16   :  { %58 = vmatpush.msra.mxu0 %v33_v20  ;;  %v146_v34 = vld [vmem:[%s359_s3] ss:$0 sm:$0xff] }
  0x17   :  { %99 = vmatpush.msra.mxu1 %v74_v21  ;;  %v147_v35 = vld [vmem:[%s361_s5] ss:$0 sm:$0xff] }
  0x18   :  { %59 = vmatpush.msra.mxu0 %v32_v22 }
  0x19   :  { %100 = vmatpush.msra.mxu1 %v73_v23 }
  0x1a   :  { %60 = vmatpush.msra.mxu0 %v31_v24 }
  0x1b   :  { %101 = vmatpush.msra.mxu1 %v72_v25 }
  0x1c   :  { %61 = vmatpush.msra.mxu0 %v30_v26 }
  0x1d   :  { %102 = vmatpush.msra.mxu1 %v71_v27 }
  0x1e   :  { %62 = vmatpush.msra.mxu0 %v29_v28 }
  0x1f   :  { %103 = vmatpush.msra.mxu1 %v70_v29 }
  0x20   :  { %63 = vmatpush.msra.mxu0 %v28_v30 }
  0x21   :  { %104 = vmatpush.msra.mxu1 %v69_v31  ;;  %64 = vmatmul.f32.vlgmr.msra.gmra.mxu0 %v27_v32 }
  0x22   :  { %105 = vmatmul.f32.vlgmr.msra.gmra.mxu1 %v68_v33 }
  0x9e   :  { %v65_v36 = vpop.f32.mrf.mxu0 }
  0x9f   :  { %v106_v37 = vpop.f32.mrf.mxu1  ;;  %v66_v38 = vadd.f32 %v146_v34, %v65_v36 }
  0xa0   :  { %v107_v39 = vadd.f32 %v147_v35, %v106_v37 }
  0xa1   :  { %110 = vst.msk [vmem:[#allocation2] sm:$0xff] %vm109_vm0, %v66_v38 }
  0xa2   :  { %111 = vst.msk [vmem:[#allocation4] sm:$0xff] %vm109_vm0, %v107_v39  ;;  %122 = dma.vmem_to_hbm [thread:$0]  %s118_s1, 128, %s120_s9, [#allocation3]  }
  0xa3   :  { %133 = dma.vmem_to_hbm [thread:$0]  %s129_s26, 128, %s131_s28, [#allocation5]  }
  0xa4   :  { %196 = dma.done.wait [#allocation3], 128  }
  0xa5   :  { %197 = vsyncadd [#allocation3], 4294967168 }
  0xa6   :  { %198 = dma.done.wait [#allocation5], 128  }
  0xa7   :  { %199 = vsyncadd [#allocation5], 4294967168 }
  0xa8   :  { %142 = vsyncpa [#allocation3], 1 }
  0xa9   :  { %143 = vsyncpa [#allocation5], 1 }

</bundles_post_ra>
